<compile_context>
chip_gen: v7x
topology: tpu7x:2x2x1
jax: 0.10.0
libtpu: 0.0.40
codegen_flags: <defaults>
</compile_context>

<pallas_src>
import jax
import jax.numpy as jnp
from jax.experimental import pallas as pl
from jax.experimental.pallas import tpu as pltpu


def _round_up(x, m):
    return (x + m - 1) // m * m


# ----------------------------------------------------------------------------
# Pallas hot path: single fused matmul + bias + tanh + adds
# ----------------------------------------------------------------------------
@jax.jit
def reaction_diffusion_forward(x, w_fused, b_fused):
    """x: (N, V) f32; w_fused: (V, 2*VP) f32; b_fused: (1, 2*VP) f32.

    VP = round_up(V, 128).  Returns tanh(A_r x + b_r) + (A_d x + b_d) + x,
    shape (N, V).
    """
    N, V = x.shape
    K, two_vp = w_fused.shape
    VP = two_vp // 2
    assert K == V, (K, V)

    def kernel(x_ref, w_ref, b_ref, o_ref):
        xb = x_ref[...]                                        # (N, V)
        y = jnp.dot(xb, w_ref[...],
                    preferred_element_type=jnp.float32)        # (N, 2*VP)
        y = y + b_ref[...]                                     # bias broadcast (VPU)
        reaction = y[:, :VP]        # A_r @ x + b_r   (lane-aligned half)
        diffusion = y[:, VP:]       # A_d @ x + b_d   (lane-aligned half)
        full = jnp.tanh(reaction) + diffusion                  # full 2x128-lane vregs
        o_ref[...] = full[:, :V] + xb                          # single 207-wide tail

    flops = 2 * N * V * (2 * VP) + 3 * N * VP
    bytes_accessed = 4 * (N * V + V * 2 * VP + 2 * VP + N * V)

    return pl.pallas_call(
        kernel,
        out_shape=jax.ShapeDtypeStruct((N, V), jnp.float32),
        grid_spec=pltpu.PrefetchScalarGridSpec(
            num_scalar_prefetch=0,
            grid=(1,),
            in_specs=[pl.BlockSpec((N, V), lambda i: (0, 0)),
                      pl.BlockSpec((V, 2 * VP), lambda i: (0, 0)),
                      pl.BlockSpec((1, 2 * VP), lambda i: (0, 0))],
            out_specs=pl.BlockSpec((N, V), lambda i: (0, 0)),
        ),
        compiler_params=pltpu.CompilerParams(
            dimension_semantics=("arbitrary",)),
        cost_estimate=pl.CostEstimate(
            flops=flops, transcendentals=N * VP,
            bytes_accessed=bytes_accessed),
    )(x, w_fused, b_fused)


# ----------------------------------------------------------------------------
# Module port (parameter / operator construction is plain-JAX glue)
# ----------------------------------------------------------------------------
class ReactionDiffusionNature:
    """Port of torch `reaction_diffusion_nature`."""

    BATCH = 64   # the torch module repeats the shared operator 64x

    def __init__(self, key, edge_i, edge_j, num_node, up_or_down, resolution):
        # TODO(synk): the torch module reads the edge list from an adjacency
        # csv (pd.read_csv); here the edge list is passed in (built
        # synthetically in __main__).
        self.resolution = resolution
        self.up, self.down = up_or_down
        self.node_size = int(num_node)
        self.edge_i = jnp.asarray(edge_i, jnp.int32)   # index   = [i, j]
        self.edge_j = jnp.asarray(edge_j, jnp.int32)   # index_a = [j, i]
        self.edge_size = int(self.edge_i.shape[0])

        k0, k1, k2, k3 = jax.random.split(key, 4)
        E, V = self.edge_size, self.node_size
        self.weight_react = jax.random.normal(k0, (1, E), jnp.float32) / 10.0
        self.weight_diff = jax.random.normal(k1, (1, E), jnp.float32) / 1000.0
        self.bias_reaction = jax.random.normal(k2, (1, V), jnp.float32) / 10.0
        self.bias_diffusion = jax.random.normal(k3, (1, V), jnp.float32) / 10.0

        # Fused operator built once (hoisted out of the per-call hot path);
        # call refresh() if parameters change.
        self.refresh()

    # -- operator construction -----------------------------------------------
    def _dense(self, vals, rows, cols):
        # torch.sparse_coo_tensor(...).to_dense() sums duplicate indices
        V = self.node_size
        return jnp.zeros((V, V), jnp.float32).at[rows, cols].add(vals)

    def _operators(self):
        R = self._dense(self.weight_react[0], self.edge_i, self.edge_j)
        RW = jnp.diag(R.sum(axis=0)) - R          # I1 - R   (column-sum diag)
        D = self._dense(self.weight_diff[0], self.edge_j, self.edge_i)
        DW = jnp.diag(D.sum(axis=0)) - D          # I2 - D
        return RW, DW

    def refresh(self):
        V = self.node_size
        VP = _round_up(V, 128)
        RW, DW = self._operators()
        # Fused weight: operators transposed and concatenated along the output
        # (lane) dim, each half padded to VP lanes.  Biases packed the same
        # way into a single (1, 2*VP) row, added in-kernel.
        w = jnp.zeros((V, 2 * VP), jnp.float32)
        w = w.at[:, :V].set(RW.T)
        w = w.at[:, VP:VP + V].set(DW.T)
        b = jnp.zeros((1, 2 * VP), jnp.float32)
        b = b.at[0, :V].set(self.bias_reaction[0])
        b = b.at[0, VP:VP + V].set(self.bias_diffusion[0])
        self.w_fused = w
        self.b_fused = b

    # -- forward --------------------------------------------------------------
    def forward(self, t, inputs):
        del t  # unused (torch only moves it to device)
        if self.up and self.down:
            return reaction_diffusion_forward(inputs, self.w_fused, self.b_fused)
        # degenerate torch branches (plain JAX; torch returns (N, V, 1) here)
        V = self.node_size
        VP = _round_up(V, 128)
        if self.up:
            reaction = inputs @ self.w_fused[:, :V] + self.bias_reaction
            return (reaction + inputs)[:, :, None]
        if self.down:
            diffusion = inputs @ self.w_fused[:, VP:VP + V] + self.bias_diffusion
            return (diffusion + inputs)[:, :, None]
        raise ValueError("bad input")

    # -- literal plain-JAX reference of the torch forward (verification) -----
    def forward_ref(self, t, inputs):
        del t
        V, B = self.node_size, self.BATCH
        RW, DW = self._operators()
        A_r = jnp.broadcast_to(RW[None], (B, V, V))
        A_d = jnp.broadcast_to(DW[None], (B, V, V))
        b_r = jnp.broadcast_to(self.bias_reaction[0][None, :, None], (B, V, 1))
        b_d = jnp.broadcast_to(self.bias_diffusion[0][None, :, None], (B, V, 1))
        x = inputs[:, :, None]
        hp = jax.lax.Precision.HIGHEST
        reaction = jnp.einsum('nvl,nwv->nwl', x, A_r, precision=hp) + b_r
        diffusion = jnp.einsum('nvl,nwv->nwl', x, A_d, precision=hp) + b_d
        return (jnp.tanh(reaction) + diffusion + x)[:, :, 0]


# ----------------------------------------------------------------------------
if __name__ == "__main__":
    key = jax.random.PRNGKey(0)
    k_ei, k_ej, k_param, k_x = jax.random.split(key, 4)

    NODE_SIZE = 207           # metr-la graph size used by the torch module
    EDGE_SIZE = 64            # synthetic edge list (stand-in for the csv)
    edge_i = jax.random.randint(k_ei, (EDGE_SIZE,), 0, NODE_SIZE, jnp.int32)
    edge_j = jax.random.randint(k_ej, (EDGE_SIZE,), 0, NODE_SIZE, jnp.int32)

    model = ReactionDiffusionNature(k_param, edge_i, edge_j,
                                    num_node=NODE_SIZE,
                                    up_or_down=[True, True],
                                    resolution=12)

    N = ReactionDiffusionNature.BATCH   # 64 (operator repeated 64x in torch)
    inputs = jax.random.normal(k_x, (N, NODE_SIZE), jnp.float32)
    t = jnp.float32(0.0)

    out = jax.block_until_ready(model.forward(t, inputs))
    ref = jax.block_until_ready(model.forward_ref(t, inputs))

    assert out.shape == (N, NODE_SIZE), out.shape
    max_err = float(jnp.max(jnp.abs(out - ref)))
    assert jnp.allclose(out, ref, rtol=1e-3, atol=1e-3), max_err
    print("KERNEL_OK")
</pallas_src>

<mosaic_0001>
module attributes {stable_mosaic.version = 11 : i64} {
  func.func @kernel(%arg0: i32, %arg1: memref<64x207xf32, #tpu.memory_space<vmem>>, %arg2: memref<207x512xf32, #tpu.memory_space<vmem>>, %arg3: memref<1x512xf32, #tpu.memory_space<vmem>>, %arg4: memref<64x207xf32, #tpu.memory_space<vmem>>) attributes {dimension_semantics = [#tpu.dimension_semantics<arbitrary>], iteration_bounds = array<i64: 1>, scalar_prefetch = 0 : i64, scratch_operands = 0 : i64, tpu.core_type = #tpu.core_type<tc>, window_params = [{pipeline_mode = #tpu.pipeline_mode<synchronous>, transform_indices = @transform_0, window_bounds = array<i64: 64, 207>}, {pipeline_mode = #tpu.pipeline_mode<synchronous>, transform_indices = @transform_1, window_bounds = array<i64: 207, 512>}, {pipeline_mode = #tpu.pipeline_mode<synchronous>, transform_indices = @transform_2, window_bounds = array<i64: 1, 512>}, {pipeline_mode = #tpu.pipeline_mode<synchronous>, transform_indices = @transform_3, window_bounds = array<i64: 64, 207>}]} {
    %c0 = arith.constant 0 : index
    %c0_0 = arith.constant 0 : index
    %0 = vector.load %arg1[%c0, %c0_0] : memref<64x207xf32, #tpu.memory_space<vmem>>, vector<64x207xf32>
    %c0_1 = arith.constant 0 : index
    %c0_2 = arith.constant 0 : index
    %1 = vector.load %arg2[%c0_1, %c0_2] : memref<207x512xf32, #tpu.memory_space<vmem>>, vector<207x512xf32>
    %cst = arith.constant dense<0.000000e+00> : vector<64x512xf32>
    %2 = tpu.matmul %0, %1, %cst {dimension_numbers = #tpu.dot_dimension_numbers<[1], [0], [0], [1], [0, 0, 1, 1], [], []>} : vector<64x207xf32>, vector<207x512xf32>, vector<64x512xf32> -> vector<64x512xf32>
    %c0_3 = arith.constant 0 : index
    %c0_4 = arith.constant 0 : index
    %3 = vector.load %arg3[%c0_3, %c0_4] : memref<1x512xf32, #tpu.memory_space<vmem>>, vector<1x512xf32>
    %4 = vector.broadcast %3 : vector<1x512xf32> to vector<64x512xf32>
    %5 = arith.addf %2, %4 : vector<64x512xf32>
    %6 = vector.extract_strided_slice %5 {offsets = [0, 0], sizes = [64, 256], strides = [1, 1]} : vector<64x512xf32> to vector<64x256xf32>
    %7 = vector.extract_strided_slice %5 {offsets = [0, 256], sizes = [64, 256], strides = [1, 1]} : vector<64x512xf32> to vector<64x256xf32>
    %8 = math.tanh %6 : vector<64x256xf32>
    %9 = arith.addf %8, %7 : vector<64x256xf32>
    %10 = vector.extract_strided_slice %9 {offsets = [0, 0], sizes = [64, 207], strides = [1, 1]} : vector<64x256xf32> to vector<64x207xf32>
    %11 = arith.addf %10, %0 : vector<64x207xf32>
    %c0_5 = arith.constant 0 : index
    %c0_6 = arith.constant 0 : index
    %12 = vector.load %arg4[%c0_5, %c0_6] : memref<64x207xf32, #tpu.memory_space<vmem>>, vector<64x207xf32>
    tpu.vector_store %arg4[%c0_5, %c0_6], %11 {strides = array<i32>} : memref<64x207xf32, #tpu.memory_space<vmem>>, vector<64x207xf32>,
    return
  }
  func.func @transform_0(%arg0: i32) -> (i32, i32) {
    %c0_i32 = arith.constant 0 : i32
    %c0_i32_0 = arith.constant 0 : i32
    %c0_i32_1 = arith.constant 0 : i32
    return %c0_i32, %c0_i32_0 : i32, i32
  }
  func.func @transform_1(%arg0: i32) -> (i32, i32) {
    %c0_i32 = arith.constant 0 : i32
    %c0_i32_0 = arith.constant 0 : i32
    %c0_i32_1 = arith.constant 0 : i32
    return %c0_i32, %c0_i32_0 : i32, i32
  }
  func.func @transform_2(%arg0: i32) -> (i32, i32) {
    %c0_i32 = arith.constant 0 : i32
    %c0_i32_0 = arith.constant 0 : i32
    %c0_i32_1 = arith.constant 0 : i32
    return %c0_i32, %c0_i32_0 : i32, i32
  }
  func.func @transform_3(%arg0: i32) -> (i32, i32) {
    %c0_i32 = arith.constant 0 : i32
    %c0_i32_0 = arith.constant 0 : i32
    %c0_i32_1 = arith.constant 0 : i32
    return %c0_i32, %c0_i32_0 : i32, i32
  }
}

</mosaic_0001>

<bundles_post_ra>
// kernel: reaction_diffusion_forward.1
= control target key start
LH: loop header
LB: loop body
LE: loop exit
PB: predicated region body
PF: predicated region fallthrough
CT: control target
= control target key end

     0   :  { %8 = vsyncpa [#allocation3], 0  ;;  %s1000_s0 = inlined_call_operand.hbm [shape: f32[64,207], index: 0, kind: input, shape index: {}]   ;;  %s1001_s1 = inlined_call_operand.hbm [shape: f32[207,512], index: 1, kind: input, shape index: {}]   ;;  %s1002_s2 = inlined_call_operand.vmem [shape: f32[1,512], index: 2, kind: input, shape index: {}]   ;;  %s1003_s3 = inlined_call_operand.hbm [shape: f32[64,207], index: 3, kind: output, shape index: {}]  }
   0x1   :  { %9 = vsyncpa [#allocation6], 0 }
   0x2   :  { %10 = vsyncpa [#allocation4], 0  ;;  %s771_s12 = smov [#allocation2]   ;;  %s699_s16 = scalar_lea.hbm %s1000_s0, 2048 }
   0x3   :  { %s16_s13 = sshll.u32 %s771_s12, 4  ;;  %p700_p0 = scmp.ne.s32.totalorder %s1000_s0, %s699_s16  ;;  %s17_s13 = int_to_ptr.vmem [resolvable:$true] %s16_s13 }
   0x4   :  { %p703_p1 = scmp.lt.u32.totalorder %s699_s16, %s1000_s0 }
   0x6   :  { %p705_p2 = pnand %p703_p1, %p700_p0 }
   0x8   :  { %708 = shalt.err (!%p705_p2)
}
   0x9   :  { %s709_s21 = scalar_lea.vmem %s17_s13, 2048  ;;  %p714_p4 = scmp.lt.s32.totalorder %s17_s13, %s17_s13 }
   0xa   :  { %p710_p3 = scmp.ne.s32.totalorder %s17_s13, %s709_s21  ;;  %p715_p5 = scmp.lt.s32.totalorder %s709_s21, %s709_s21 }
   0xc   :  { %p716_p6 = por %p715_p5, %p714_p4 }
   0xe   :  { %p717_p7 = pnand %p716_p6, %p710_p3 }
  0x10   :  { %720 = shalt.err (!%p717_p7)
}
  0x11   :  { %s772_s22 = smov 256   ;;  %s773_s23 = smov 16  }
  0x12   :  { %22 = dma.hbm_to_vmem [thread:$0]  %s1000_s0, 2048, %s17_s13, [#allocation3], %s772_s22, %s772_s22, %s773_s23  }
  0x13   :  { %s774_s26 = smov [#allocation5]   ;;  %s721_s30 = scalar_lea.hbm %s1001_s1, 13312 }
  0x14   :  { %s28_s27 = sshll.u32 %s774_s26, 4  ;;  %p722_p8 = scmp.ne.s32.totalorder %s1001_s1, %s721_s30  ;;  %s29_s27 = int_to_ptr.vmem [resolvable:$true] %s28_s27 }
  0x15   :  { %p725_p9 = scmp.lt.u32.totalorder %s721_s30, %s1001_s1 }
  0x17   :  { %p727_p10 = pnand %p725_p9, %p722_p8 }
  0x19   :  { %730 = shalt.err (!%p727_p10)
}
  0x1a   :  { %s731_s8 = scalar_lea.vmem %s29_s27, 13312  ;;  %p736_p12 = scmp.lt.s32.totalorder %s29_s27, %s29_s27 }
  0x1b   :  { %p732_p11 = scmp.ne.s32.totalorder %s29_s27, %s731_s8  ;;  %p737_p13 = scmp.lt.s32.totalorder %s731_s8, %s731_s8 }
  0x1d   :  { %p738_p0 = por %p737_p13, %p736_p12 }
  0x1f   :  { %p739_p1 = pnand %p738_p0, %p732_p11 }
  0x21   :  { %742 = shalt.err (!%p739_p1)
}
  0x22   :  { %s775_s0 = smov 512   ;;  %s776_s9 = smov 32  }
  0x23   :  { %34 = dma.hbm_to_vmem [thread:$0]  %s1001_s1, 13312, %s29_s27, [#allocation6], %s775_s0, %s775_s0, %s776_s9  }
  0x24   :  { %765 = dma.done.wait [#allocation3], 2048  }
  0x25   :  { %766 = vsyncadd [#allocation3], 4294965248 }
  0x26   :  { %767 = dma.done.wait [#allocation6], 13312  }
  0x27   :  { %768 = vsyncadd [#allocation6], 4294953984  ;;  %v60_v0 = vld [vmem:[#allocation5 + $0x8] sm:$0xff]  ;;  %v59_v2 = vld [vmem:[#allocation5] sm:$0xff]  ;;  %vm185_vm0 = vcmask 646144   ;;  %vm210_vm1 = vcmask 1046528  }
  0x28   :  { %v64_v1 = vld [vmem:[#allocation5 + $0x28] sm:$0xff]  ;;  %v63_v4 = vld [vmem:[#allocation5 + $0x20] sm:$0xff]  ;;  %v62_v14 = vld [vmem:[#allocation5 + $0x18] sm:$0xff]  ;;  %vm777_vm2 = vmmov 1  }
  0x29   :  { %v551_v3 = vpack.c.bf16 %v64_v1, %v60_v0  ;;  %v68_v5 = vld [vmem:[#allocation5 + $0x48] sm:$0xff]  ;;  %v553_v7 = vpack.c.bf16 %v63_v4, %v59_v2  ;;  %v67_v9 = vld [vmem:[#allocation5 + $0x40] sm:$0xff]  ;;  %v66_v15 = vld [vmem:[#allocation5 + $0x38] sm:$0xff] }
  0x2a   :  { %v72_v6 = vld [vmem:[#allocation5 + $0x68] sm:$0xff]  ;;  %v71_v10 = vld [vmem:[#allocation5 + $0x60] sm:$0xff]  ;;  %v61_v16 = vld [vmem:[#allocation5 + $0x10] sm:$0xff]  ;;  %v605_v20 = vpack.c.bf16 %v66_v15, %v62_v14 }
  0x2b   :  { %v555_v8 = vpack.c.bf16 %v72_v6, %v68_v5  ;;  %v76_v11 = vld [vmem:[#allocation5 + $0x88] sm:$0xff]  ;;  %552 = vmatprep.subr.bf16.mxu0 %v551_v3  ;;  %v557_v13 = vpack.c.bf16 %v71_v10, %v67_v9  ;;  %v75_v18 = vld [vmem:[#allocation5 + $0x80] sm:$0xff]  ;;  %v65_v21 = vld [vmem:[#allocation5 + $0x30] sm:$0xff] }
  0x2c   :  { %v80_v12 = vld [vmem:[#allocation5 + $0xa8] sm:$0xff]  ;;  %554 = vmatpush1.bf16.msra.mxu0 %v553_v7  ;;  %v79_v19 = vld [vmem:[#allocation5 + $0xa0] sm:$0xff]  ;;  %v607_v22 = vpack.c.bf16 %v65_v21, %v61_v16  ;;  %v70_v25 = vld [vmem:[#allocation5 + $0x58] sm:$0xff]  ;;  %606 = vmatprep.subr.bf16.mxu1 %v605_v20 }
  0x2d   :  { %556 = vmatprep.subr.bf16.mxu0 %v555_v8  ;;  %v559_v17 = vpack.c.bf16 %v80_v12, %v76_v11  ;;  %v84_v23 = vld [vmem:[#allocation5 + $0xc8] sm:$0xff]  ;;  %v74_v26 = vld [vmem:[#allocation5 + $0x78] sm:$0xff]  ;;  %v69_v27 = vld [vmem:[#allocation5 + $0x50] sm:$0xff]  ;;  %v561_v29 = vpack.c.bf16 %v79_v19, %v75_v18 }
  0x2e   :  { %v88_v24 = vld [vmem:[#allocation5 + $0xe8] sm:$0xff]  ;;  %v73_v28 = vld [vmem:[#allocation5 + $0x70] sm:$0xff]  ;;  %608 = vmatpush1.bf16.msra.mxu1 %v607_v22  ;;  %v83_v30 = vld [vmem:[#allocation5 + $0xc0] sm:$0xff]  ;;  %v609_v32 = vpack.c.bf16 %v74_v26, %v70_v25 }
  0x2f   :  { %v87_v31 = vld [vmem:[#allocation5 + $0xe0] sm:$0xff]  ;;  %v611_v33 = vpack.c.bf16 %v73_v28, %v69_v27  ;;  %v563_v34 = vpack.c.bf16 %v88_v24, %v84_v23  ;;  %v92_v35 = vld [vmem:[#allocation5 + $0x108] sm:$0xff]  ;;  %v78_v36 = vld [vmem:[#allocation5 + $0x98] sm:$0xff] }
  0x30   :  { %558 = vmatpush1.bf16.msra.mxu0 %v557_v13  ;;  %v82_v37 = vld [vmem:[#allocation5 + $0xb8] sm:$0xff]  ;;  %610 = vmatprep.subr.bf16.mxu1 %v609_v32  ;;  %v96_v38 = vld [vmem:[#allocation5 + $0x128] sm:$0xff]  ;;  %v77_v40 = vld [vmem:[#allocation5 + $0x90] sm:$0xff]  ;;  %v565_v42 = vpack.c.bf16 %v87_v31, %v83_v30 }
  0x31   :  { %560 = vmatprep.subr.bf16.mxu0 %v559_v17  ;;  %v613_v39 = vpack.c.bf16 %v82_v37, %v78_v36  ;;  %v81_v41 = vld [vmem:[#allocation5 + $0xb0] sm:$0xff]  ;;  %v91_v43 = vld [vmem:[#allocation5 + $0x100] sm:$0xff]  ;;  %v86_v45 = vld [vmem:[#allocation5 + $0xd8] sm:$0xff]  ;;  %v567_v47 = vpack.c.bf16 %v96_v38, %v92_v35 }
  0x32   :  { %612 = vmatpush1.bf16.msra.mxu1 %v611_v33  ;;  %v615_v44 = vpack.c.bf16 %v81_v41, %v77_v40  ;;  %v90_v46 = vld [vmem:[#allocation5 + $0xf8] sm:$0xff]  ;;  %v95_v48 = vld [vmem:[#allocation5 + $0x120] sm:$0xff]  ;;  %v85_v50 = vld [vmem:[#allocation5 + $0xd0] sm:$0xff] }
  0x33   :  { %614 = vmatprep.subr.bf16.mxu1 %v613_v39  ;;  %v617_v49 = vpack.c.bf16 %v90_v46, %v86_v45  ;;  %v89_v51 = vld [vmem:[#allocation5 + $0xf0] sm:$0xff]  ;;  %v100_v52 = vld [vmem:[#allocation5 + $0x148] sm:$0xff]  ;;  %v94_v54 = vld [vmem:[#allocation5 + $0x118] sm:$0xff]  ;;  %v569_v56 = vpack.c.bf16 %v95_v48, %v91_v43 }
  0x34   :  { %562 = vmatpush1.bf16.msra.mxu0 %v561_v29  ;;  %v104_v53 = vld [vmem:[#allocation5 + $0x168] sm:$0xff]  ;;  %v98_v55 = vld [vmem:[#allocation5 + $0x138] sm:$0xff]  ;;  %v99_v57 = vld [vmem:[#allocation5 + $0x140] sm:$0xff]  ;;  %v619_v59 = vpack.c.bf16 %v89_v51, %v85_v50 }
  0x35   :  { %564 = vmatprep.subr.bf16.mxu0 %v563_v34  ;;  %v103_v58 = vld [vmem:[#allocation5 + $0x160] sm:$0xff]  ;;  %v571_v60 = vpack.c.bf16 %v104_v53, %v100_v52  ;;  %v108_v61 = vld [vmem:[#allocation5 + $0x188] sm:$0xff]  ;;  %v621_v62 = vpack.c.bf16 %v98_v55, %v94_v54  ;;  %v93_v63 = vld [vmem:[#allocation5 + $0x110] sm:$0xff] }
  0x36   :  { %616 = vmatpush1.bf16.msra.mxu1 %v615_v44  ;;  %v97_v0 = vld [vmem:[#allocation5 + $0x130] sm:$0xff]  ;;  %v112_v1 = vld [vmem:[#allocation5 + $0x1a8] sm:$0xff]  ;;  %v102_v2 = vld [vmem:[#allocation5 + $0x158] sm:$0xff]  ;;  %v573_v4 = vpack.c.bf16 %v103_v58, %v99_v57 }
  0x37   :  { %618 = vmatprep.subr.bf16.mxu1 %v617_v49  ;;  %v106_v3 = vld [vmem:[#allocation5 + $0x178] sm:$0xff]  ;;  %v107_v5 = vld [vmem:[#allocation5 + $0x180] sm:$0xff]  ;;  %v623_v7 = vpack.c.bf16 %v97_v0, %v93_v63  ;;  %v575_v8 = vpack.c.bf16 %v112_v1, %v108_v61  ;;  %v116_v9 = vld [vmem:[#allocation5 + $0x1c8] sm:$0xff] }
  0x38   :  { %566 = vmatpush1.bf16.msra.mxu0 %v565_v42  ;;  %v111_v6 = vld [vmem:[#allocation5 + $0x1a0] sm:$0xff]  ;;  %v625_v10 = vpack.c.bf16 %v106_v3, %v102_v2  ;;  %v101_v11 = vld [vmem:[#allocation5 + $0x150] sm:$0xff]  ;;  %v120_v13 = vld [vmem:[#allocation5 + $0x1e8] sm:$0xff] }
  0x39   :  { %568 = vmatprep.subr.bf16.mxu0 %v567_v47  ;;  %v105_v12 = vld [vmem:[#allocation5 + $0x170] sm:$0xff]  ;;  %v110_v14 = vld [vmem:[#allocation5 + $0x198] sm:$0xff]  ;;  %v577_v16 = vpack.c.bf16 %v111_v6, %v107_v5  ;;  %v115_v17 = vld [vmem:[#allocation5 + $0x1c0] sm:$0xff]  ;;  %v579_v20 = vpack.c.bf16 %v120_v13, %v116_v9 }
  0x3a   :  { %620 = vmatpush1.bf16.msra.mxu1 %v619_v59  ;;  %v114_v15 = vld [vmem:[#allocation5 + $0x1b8] sm:$0xff]  ;;  %v119_v18 = vld [vmem:[#allocation5 + $0x1e0] sm:$0xff]  ;;  %v627_v19 = vpack.c.bf16 %v105_v12, %v101_v11  ;;  %v124_v21 = vld [vmem:[#allocation5 + $0x208] sm:$0xff] }
  0x3b   :  { %622 = vmatprep.subr.bf16.mxu1 %v621_v62  ;;  %v629_v22 = vpack.c.bf16 %v114_v15, %v110_v14  ;;  %v109_v23 = vld [vmem:[#allocation5 + $0x190] sm:$0xff]  ;;  %v128_v25 = vld [vmem:[#allocation5 + $0x228] sm:$0xff]  ;;  %v118_v26 = vld [vmem:[#allocation5 + $0x1d8] sm:$0xff]  ;;  %v581_v28 = vpack.c.bf16 %v119_v18, %v115_v17 }
  0x3c   :  { %570 = vmatpush1.bf16.msra.mxu0 %v569_v56  ;;  %v113_v24 = vld [vmem:[#allocation5 + $0x1b0] sm:$0xff]  ;;  %v122_v27 = vld [vmem:[#allocation5 + $0x1f8] sm:$0xff]  ;;  %v123_v29 = vld [vmem:[#allocation5 + $0x200] sm:$0xff]  ;;  %v583_v32 = vpack.c.bf16 %v128_v25, %v124_v21 }
  0x3d   :  { %572 = vmatprep.subr.bf16.mxu0 %v571_v60  ;;  %v127_v30 = vld [vmem:[#allocation5 + $0x220] sm:$0xff]  ;;  %v631_v31 = vpack.c.bf16 %v113_v24, %v109_v23  ;;  %v132_v33 = vld [vmem:[#allocation5 + $0x248] sm:$0xff]  ;;  %v633_v34 = vpack.c.bf16 %v122_v27, %v118_v26  ;;  %v117_v35 = vld [vmem:[#allocation5 + $0x1d0] sm:$0xff] }
  0x3e   :  { %624 = vmatpush1.bf16.msra.mxu1 %v623_v7  ;;  %v121_v36 = vld [vmem:[#allocation5 + $0x1f0] sm:$0xff]  ;;  %v136_v37 = vld [vmem:[#allocation5 + $0x268] sm:$0xff]  ;;  %v126_v38 = vld [vmem:[#allocation5 + $0x218] sm:$0xff]  ;;  %v585_v41 = vpack.c.bf16 %v127_v30, %v123_v29 }
  0x3f   :  { %626 = vmatprep.subr.bf16.mxu1 %v625_v10  ;;  %v130_v39 = vld [vmem:[#allocation5 + $0x238] sm:$0xff]  ;;  %v826_v40 = vld [vmem:[#allocation2 + $0x8] sm:$0xff]  ;;  %v131_v42 = vld [vmem:[#allocation5 + $0x240] sm:$0xff]  ;;  %v635_v44 = vpack.c.bf16 %v121_v36, %v117_v35  ;;  %v587_v45 = vpack.c.bf16 %v136_v37, %v132_v33 }
  0x40   :  { %574 = vmatpush1.bf16.msra.mxu0 %v573_v4  ;;  %v135_v43 = vld [vmem:[#allocation5 + $0x260] sm:$0xff]  ;;  %v140_v46 = vld [vmem:[#allocation5 + $0x288] sm:$0xff]  ;;  %v637_v47 = vpack.c.bf16 %v130_v39, %v126_v38  ;;  %v125_v48 = vld [vmem:[#allocation5 + $0x210] sm:$0xff]  ;;  %533 = vmatprep.mubr.msk.f32.mxu0 %vm185_vm0, %v826_v40 }
  0x41   :  { %576 = vmatprep.subr.bf16.mxu0 %v575_v8  ;;  %v129_v49 = vld [vmem:[#allocation5 + $0x230] sm:$0xff]  ;;  %v144_v50 = vld [vmem:[#allocation5 + $0x2a8] sm:$0xff]  ;;  %v134_v51 = vld [vmem:[#allocation5 + $0x258] sm:$0xff]  ;;  %543 = vmatprep.mubr.msk.f32.mxu1 %vm185_vm0, %v826_v40  ;;  %v589_v53 = vpack.c.bf16 %v135_v43, %v131_v42 }
  0x42   :  { %628 = vmatpush1.bf16.msra.mxu1 %v627_v19  ;;  %v138_v52 = vld [vmem:[#allocation5 + $0x278] sm:$0xff]  ;;  %v139_v54 = vld [vmem:[#allocation5 + $0x280] sm:$0xff]  ;;  %v639_v56 = vpack.c.bf16 %v129_v49, %v125_v48  ;;  %v591_v57 = vpack.c.bf16 %v144_v50, %v140_v46  ;;  %v148_v58 = vld [vmem:[#allocation5 + $0x2c8] sm:$0xff]  ;;  %v165_v46 = vlaneseq }
  0x43   :  { %630 = vmatprep.subr.bf16.mxu1 %v629_v22  ;;  %v143_v55 = vld [vmem:[#allocation5 + $0x2a0] sm:$0xff]  ;;  %v641_v59 = vpack.c.bf16 %v138_v52, %v134_v51  ;;  %v133_v60 = vld [vmem:[#allocation5 + $0x250] sm:$0xff]  ;;  %v152_v62 = vld [vmem:[#allocation5 + $0x2e8] sm:$0xff] }
  0x44   :  { %578 = vmatpush1.bf16.msra.mxu0 %v577_v16  ;;  %v137_v61 = vld [vmem:[#allocation5 + $0x270] sm:$0xff]  ;;  %v142_v63 = vld [vmem:[#allocation5 + $0x298] sm:$0xff]  ;;  %v593_v1 = vpack.c.bf16 %v143_v55, %v139_v54  ;;  %v147_v2 = vld [vmem:[#allocation5 + $0x2c0] sm:$0xff]  ;;  %v595_v5 = vpack.c.bf16 %v152_v62, %v148_v58 }
  0x45   :  { %580 = vmatprep.subr.bf16.mxu0 %v579_v20  ;;  %v146_v0 = vld [vmem:[#allocation5 + $0x2b8] sm:$0xff]  ;;  %v151_v3 = vld [vmem:[#allocation5 + $0x2e0] sm:$0xff]  ;;  %v643_v4 = vpack.c.bf16 %v137_v61, %v133_v60  ;;  %v156_v6 = vld [vmem:[#allocation5 + $0x308] sm:$0xff] }
  0x46   :  { %632 = vmatpush1.bf16.msra.mxu1 %v631_v31  ;;  %v645_v7 = vpack.c.bf16 %v146_v0, %v142_v63  ;;  %v141_v8 = vld [vmem:[#allocation5 + $0x290] sm:$0xff]  ;;  %v160_v10 = vld [vmem:[#allocation5 + $0x328] sm:$0x7f]  ;;  %v150_v11 = vld [vmem:[#allocation5 + $0x2d8] sm:$0xff]  ;;  %v597_v13 = vpack.c.bf16 %v151_v3, %v147_v2 }
  0x47   :  { %634 = vmatprep.subr.bf16.mxu1 %v633_v34  ;;  %v145_v9 = vld [vmem:[#allocation5 + $0x2b0] sm:$0xff]  ;;  %v154_v12 = vld [vmem:[#allocation5 + $0x2f8] sm:$0xff]  ;;  %v155_v14 = vld [vmem:[#allocation5 + $0x300] sm:$0xff]  ;;  %v599_v16 = vpack.c.bf16 %v160_v10, %v156_v6 }
  0x48   :  { %582 = vmatpush1.bf16.msra.mxu0 %v581_v28  ;;  %v647_v15 = vpack.c.bf16 %v145_v9, %v141_v8  ;;  %v159_v17 = vld [vmem:[#allocation5 + $0x320] sm:$0x7f]  ;;  %v649_v18 = vpack.c.bf16 %v154_v12, %v150_v11  ;;  %v149_v19 = vld [vmem:[#allocation5 + $0x2d0] sm:$0xff]  ;;  %vm832_vm3 = vmpackc.low %vm210_vm1, %vm777_vm2 }
  0x49   :  { %584 = vmatprep.subr.bf16.mxu0 %v583_v32  ;;  %v153_v20 = vld [vmem:[#allocation5 + $0x2f0] sm:$0xff]  ;;  %v158_v22 = vld [vmem:[#allocation5 + $0x318] sm:$0xff]  ;;  %v602_v24 = vpack.c.bf16 %v159_v17, %v155_v14  ;;  %v840_v29 = vld [vmem:[#allocation2] sm:$0xff] }
  0x4a   :  { %636 = vmatpush1.bf16.msra.mxu1 %v635_v44  ;;  %v162_v23 = vld [vmem:[#allocation5 + $0x338] sm:$0x7f]  ;;  %v651_v25 = vpack.c.bf16 %v153_v20, %v149_v19  ;;  %v157_v27 = vld [vmem:[#allocation5 + $0x310] sm:$0xff]  ;;  %v853_v33 = vld [vmem:[#allocation2 + $0x28] sm:$0xff] }
  0x4b   :  { %638 = vmatprep.subr.bf16.mxu1 %v637_v47  ;;  %v653_v26 = vpack.c.bf16 %v162_v23, %v158_v22  ;;  %v161_v28 = vld [vmem:[#allocation5 + $0x330] sm:$0x7f]  ;;  %v842_v31 = vld [vmem:[#allocation2 + $0x18] sm:$0xff]  ;;  %v859_v34 = vld [vmem:[#allocation2 + $0x20] sm:$0xff]  ;;  %v166_v47 = vshrl.u32 %v165_v46, 7 }
  0x4c   :  { %586 = vmatpush1.bf16.msra.mxu0 %v585_v41  ;;  %v656_v30 = vpack.c.bf16 %v161_v28, %v157_v27  ;;  %v849_v32 = vld [vmem:[#allocation2 + $0x10] sm:$0xff]  ;;  %v863_v35 = vld [vmem:[#allocation2 + $0x38] sm:$0xff]  ;;  %v873_v37 = vld [vmem:[#allocation2 + $0x48] sm:$0xff] }
  0x4d   :  { %588 = vmatprep.subr.bf16.mxu0 %v587_v45  ;;  %v869_v36 = vld [vmem:[#allocation2 + $0x30] sm:$0xff]  ;;  %v879_v38 = vld [vmem:[#allocation2 + $0x40] sm:$0xff]  ;;  %v883_v39 = vld [vmem:[#allocation2 + $0x58] sm:$0xff]  ;;  %v167_v48 = vsub.s32 0, %v166_v47  ;;  %v171_v50 = vsub.s32 1, %v166_v47  ;;  %v179_v58 = vsub.s32 3, %v166_v47 }
  0x4e   :  { %640 = vmatpush1.bf16.msra.mxu1 %v639_v56  ;;  %v889_v41 = vld [vmem:[#allocation2 + $0x50] sm:$0xff]  ;;  %v893_v42 = vld [vmem:[#allocation2 + $0x68] sm:$0xff]  ;;  %v899_v43 = vld [vmem:[#allocation2 + $0x60] sm:$0xff] }
  0x4f   :  { %642 = vmatprep.subr.bf16.mxu1 %v641_v59  ;;  %v903_v44 = vld [vmem:[#allocation2 + $0x78] sm:$0xff]  ;;  %v909_v45 = vld [vmem:[#allocation2 + $0x70] sm:$0xff]  ;;  %v163_v49 = vld [vmem:[%s1002_s2] sm:$0xf]  ;;  %s778_s2 = smov [#allocation7]  }
  0x50   :  { %590 = vmatpush1.bf16.msra.mxu0 %v589_v53  ;;  %v921_v51 = vrot.slane %v163_v49, %v167_v48  ;;  %v923_v52 = vrot.slane %v163_v49, %v171_v50  ;;  %v931_v2 = vrot.slane %v163_v49, %v179_v58  ;;  %s518_s13 = sshll.u32 %s778_s2, 4  ;;  %s519_s13 = int_to_ptr.vmem [resolvable:$true] %s518_s13 }
  0x51   :  { %592 = vmatprep.subr.bf16.mxu0 %v591_v57  ;;  %v175_v57 = vsub.s32 2, %v166_v47  ;;  %s743_s14 = scalar_lea.vmem %s519_s13, 2048  ;;  %p748_p3 = scmp.lt.s32.totalorder %s519_s13, %s519_s13 }
  0x52   :  { %644 = vmatpush1.bf16.msra.mxu1 %v643_v4  ;;  %p744_p2 = scmp.ne.s32.totalorder %s519_s13, %s743_s14  ;;  %p749_p4 = scmp.lt.s32.totalorder %s743_s14, %s743_s14 }
  0x53   :  { %646 = vmatprep.subr.bf16.mxu1 %v645_v7 }
  0x54   :  { %594 = vmatpush1.bf16.msra.mxu0 %v593_v1  ;;  %v929_v1 = vrot.slane %v163_v49, %v175_v57  ;;  %p750_p5 = por %p749_p4, %p748_p3 }
  0x55   :  { %596 = vmatprep.subr.bf16.mxu0 %v595_v5 }
  0x56   :  { %648 = vmatpush1.bf16.msra.mxu1 %v647_v15  ;;  %p751_p6 = pnand %p750_p5, %p744_p2 }
  0x57   :  { %650 = vmatprep.subr.bf16.mxu1 %v649_v18 }
  0x58   :  { %598 = vmatpush1.bf16.msra.mxu0 %v597_v13 }
  0x59   :  { %601 = vmatprep.subr.msk.bf16.mxu0 %vm832_vm3, %v599_v16 }
  0x5a   :  { %652 = vmatpush1.bf16.msra.mxu1 %v651_v25 }
  0x5b   :  { %655 = vmatprep.subr.msk.bf16.mxu1 %vm832_vm3, %v653_v26 }
  0x5c   :  { %604 = vmatpush1.bf16.msk.msra.mxu0 %vm832_vm3, %v602_v24 }
  0x5e   :  { %658 = vmatpush1.bf16.msk.msra.mxu1 %vm832_vm3, %v656_v30 }
  0x5f   :  { %288 = vmatmul.mubr.f32.vlgmr.msra.gmra.mrb[0].mxu0 %v840_v29 }
  0x60   :  { %534 = vmatprep.mubr.msk.f32.mxu0 %vm185_vm0, %v842_v31 }
  0x61   :  { %401 = vmatmul.mubr.f32.vlgmr.msra.gmra.mrb[0].mxu1 %v840_v29 }
  0x62   :  { %544 = vmatprep.mubr.msk.f32.mxu1 %vm185_vm0, %v842_v31 }
  0x63   :  { %294 = vmatmul.mubr.f32.gmra.mrb[2].mxu0 %v849_v32 }
  0x64   :  { %535 = vmatprep.mubr.msk.f32.mxu0 %vm185_vm0, %v853_v33 }
  0x65   :  { %407 = vmatmul.mubr.f32.gmra.mrb[2].mxu1 %v849_v32 }
  0x66   :  { %545 = vmatprep.mubr.msk.f32.mxu1 %vm185_vm0, %v853_v33 }
  0x67   :  { %300 = vmatmul.mubr.f32.gmra.mrb[4].mxu0 %v859_v34 }
  0x68   :  { %536 = vmatprep.mubr.msk.f32.mxu0 %vm185_vm0, %v863_v35 }
  0x69   :  { %413 = vmatmul.mubr.f32.gmra.mrb[4].mxu1 %v859_v34 }
  0x6a   :  { %546 = vmatprep.mubr.msk.f32.mxu1 %vm185_vm0, %v863_v35 }
  0x6b   :  { %306 = vmatmul.mubr.f32.gmra.mrb[6].mxu0 %v869_v36 }
  0x6c   :  { %537 = vmatprep.mubr.msk.f32.mxu0 %vm185_vm0, %v873_v37 }
  0x6d   :  { %419 = vmatmul.mubr.f32.gmra.mrb[6].mxu1 %v869_v36 }
  0x6e   :  { %547 = vmatprep.mubr.msk.f32.mxu1 %vm185_vm0, %v873_v37 }
  0x6f   :  { %312 = vmatmul.mubr.f32.gmra.mrb[8].mxu0 %v879_v38 }
  0x70   :  { %538 = vmatprep.mubr.msk.f32.mxu0 %vm185_vm0, %v883_v39 }
  0x71   :  { %425 = vmatmul.mubr.f32.gmra.mrb[8].mxu1 %v879_v38 }
  0x72   :  { %548 = vmatprep.mubr.msk.f32.mxu1 %vm185_vm0, %v883_v39 }
  0x73   :  { %318 = vmatmul.mubr.f32.gmra.mrb[10].mxu0 %v889_v41 }
  0x74   :  { %539 = vmatprep.mubr.msk.f32.mxu0 %vm185_vm0, %v893_v42 }
  0x75   :  { %431 = vmatmul.mubr.f32.gmra.mrb[10].mxu1 %v889_v41 }
  0x76   :  { %549 = vmatprep.mubr.msk.f32.mxu1 %vm185_vm0, %v893_v42 }
  0x77   :  { %324 = vmatmul.mubr.f32.gmra.mrb[12].mxu0 %v899_v43 }
  0x78   :  { %540 = vmatprep.mubr.msk.f32.mxu0 %vm185_vm0, %v903_v44 }
  0x79   :  { %437 = vmatmul.mubr.f32.gmra.mrb[12].mxu1 %v899_v43 }
  0x7a   :  { %550 = vmatprep.mubr.msk.f32.mxu1 %vm185_vm0, %v903_v44 }
  0x7b   :  { %330 = vmatmul.mubr.f32.gmra.mrb[14].mxu0 %v909_v45 }
  0x7d   :  { %443 = vmatmul.mubr.f32.gmra.mrb[14].mxu1 %v909_v45 }
 0x132   :  { %v289_v53 = vpop.f32.mrb[0].mxu0 }
 0x133   :  { %v290_v54 = vadd.f32 %v289_v53, %v921_v51  ;;  %v291_v55 = vpop.f32.mrb[1].mxu0 }
 0x134   :  { %v292_v56 = vadd.f32 %v291_v55, %v923_v52  ;;  %v402_v60 = vpop.f32.mrb[0].mxu1 }
 0x135   :  { %667 = vtanh.f32 %v290_v54  ;;  %v404_v63 = vpop.f32.mrb[1].mxu1  ;;  %v403_v9 = vadd.f32 %v402_v60, %v929_v1 }
 0x136   :  { %669 = vtanh.f32 %v292_v56  ;;  %v295_v59 = vpop.f32.mrb[2].mxu0  ;;  %v405_v10 = vadd.f32 %v404_v63, %v931_v2 }
 0x137   :  { %v296_v61 = vadd.f32 %v295_v59, %v921_v51  ;;  %v297_v62 = vpop.f32.mrb[3].mxu0 }
 0x138   :  { %v298_v0 = vadd.f32 %v297_v62, %v923_v52  ;;  %v408_v4 = vpop.f32.mrb[2].mxu1 }
 0x139   :  { %671 = vtanh.f32 %v296_v61  ;;  %v410_v7 = vpop.f32.mrb[3].mxu1  ;;  %v409_v20 = vadd.f32 %v408_v4, %v929_v1 }
 0x13a   :  { %673 = vtanh.f32 %v298_v0  ;;  %v301_v3 = vpop.f32.mrb[4].mxu0  ;;  %v411_v22 = vadd.f32 %v410_v7, %v931_v2 }
 0x13b   :  { %v302_v5 = vadd.f32 %v301_v3, %v921_v51  ;;  %v303_v6 = vpop.f32.mrb[5].mxu0 }
 0x13c   :  { %v304_v8 = vadd.f32 %v303_v6, %v923_v52  ;;  %v414_v12 = vpop.f32.mrb[4].mxu1 }
 0x13d   :  { %675 = vtanh.f32 %v302_v5  ;;  %v416_v16 = vpop.f32.mrb[5].mxu1  ;;  %v415_v50 = vadd.f32 %v414_v12, %v929_v1 }
 0x13e   :  { %677 = vtanh.f32 %v304_v8  ;;  %v307_v11 = vpop.f32.mrb[6].mxu0  ;;  %v417_v53 = vadd.f32 %v416_v16, %v931_v2 }
 0x13f   :  { %v668_v13 = vpop.eup %667  ;;  %v308_v14 = vadd.f32 %v307_v11, %v921_v51  ;;  %v309_v15 = vpop.f32.mrb[7].mxu0 }
 0x140   :  { %v670_v17 = vpop.eup %669  ;;  %v465_v18 = vadd.f32 %v668_v13, %v403_v9  ;;  %v310_v19 = vadd.f32 %v309_v15, %v923_v52  ;;  %v420_v25 = vpop.f32.mrb[6].mxu1 }
 0x141   :  { %v466_v21 = vadd.f32 %v670_v17, %v405_v10  ;;  %679 = vtanh.f32 %v308_v14  ;;  %v422_v46 = vpop.f32.mrb[7].mxu1  ;;  %v421_v0 = vadd.f32 %v420_v25, %v929_v1 }
 0x142   :  { %v481_v23 = vadd.f32 %v465_v18, %v840_v29  ;;  %681 = vtanh.f32 %v310_v19  ;;  %v313_v24 = vpop.f32.mrb[8].mxu0  ;;  %v423_v3 = vadd.f32 %v422_v46, %v931_v2 }
 0x143   :  { %v672_v26 = vpop.eup %671  ;;  %v482_v27 = vadd.f32 %v466_v21, %v826_v40  ;;  %v314_v28 = vadd.f32 %v313_v24, %v921_v51  ;;  %v315_v30 = vpop.f32.mrb[9].mxu0 }
 0x144   :  { %v674_v47 = vpop.eup %673  ;;  %497 = vst [vmem:[#allocation7] sm:$0xff] %v481_v23  ;;  %v467_v48 = vadd.f32 %v672_v26, %v409_v20  ;;  %v316_v49 = vadd.f32 %v315_v30, %v923_v52  ;;  %v426_v55 = vpop.f32.mrb[8].mxu1 }
 0x145   :  { %498 = vst.msk [vmem:[#allocation7 + $0x8] sm:$0xff] %vm185_vm0, %v482_v27  ;;  %v468_v29 = vadd.f32 %v674_v47, %v411_v22  ;;  %683 = vtanh.f32 %v314_v28  ;;  %v428_v60 = vpop.f32.mrb[9].mxu1  ;;  %v427_v14 = vadd.f32 %v426_v55, %v929_v1 }
 0x146   :  { %v483_v54 = vadd.f32 %v467_v48, %v849_v32  ;;  %685 = vtanh.f32 %v316_v49  ;;  %v319_v40 = vpop.f32.mrb[10].mxu0  ;;  %v429_v15 = vadd.f32 %v428_v60, %v931_v2 }
 0x147   :  { %v676_v56 = vpop.eup %675  ;;  %v484_v57 = vadd.f32 %v468_v29, %v842_v31  ;;  %v320_v58 = vadd.f32 %v319_v40, %v921_v51  ;;  %v321_v59 = vpop.f32.mrb[11].mxu0 }
 0x148   :  { %v678_v61 = vpop.eup %677  ;;  %499 = vst [vmem:[#allocation7 + $0x10] sm:$0xff] %v483_v54  ;;  %v469_v62 = vadd.f32 %v676_v56, %v415_v50  ;;  %v322_v63 = vadd.f32 %v321_v59, %v923_v52  ;;  %v432_v5 = vpop.f32.mrb[10].mxu1 }
 0x149   :  { %500 = vst.msk [vmem:[#allocation7 + $0x18] sm:$0xff] %vm185_vm0, %v484_v57  ;;  %v470_v32 = vadd.f32 %v678_v61, %v417_v53  ;;  %687 = vtanh.f32 %v320_v58  ;;  %v434_v10 = vpop.f32.mrb[11].mxu1  ;;  %v433_v26 = vadd.f32 %v432_v5, %v929_v1 }
 0x14a   :  { %v485_v4 = vadd.f32 %v469_v62, %v859_v34  ;;  %689 = vtanh.f32 %v322_v63  ;;  %v325_v31 = vpop.f32.mrb[12].mxu0  ;;  %v435_v27 = vadd.f32 %v434_v10, %v931_v2 }
 0x14b   :  { %v680_v6 = vpop.eup %679  ;;  %v486_v7 = vadd.f32 %v470_v32, %v853_v33  ;;  %v326_v8 = vadd.f32 %v325_v31, %v921_v51  ;;  %v327_v9 = vpop.f32.mrb[13].mxu0 }
 0x14c   :  { %v682_v11 = vpop.eup %681  ;;  %501 = vst [vmem:[#allocation7 + $0x20] sm:$0xff] %v485_v4  ;;  %v471_v12 = vadd.f32 %v680_v6, %v421_v0  ;;  %v328_v13 = vadd.f32 %v327_v9, %v923_v52  ;;  %v438_v17 = vpop.f32.mrb[12].mxu1 }
 0x14d   :  { %502 = vst.msk [vmem:[#allocation7 + $0x28] sm:$0xff] %vm185_vm0, %v486_v7  ;;  %v472_v34 = vadd.f32 %v682_v11, %v423_v3  ;;  %691 = vtanh.f32 %v326_v8  ;;  %v440_v22 = vpop.f32.mrb[13].mxu1 }
 0x14e   :  { %v487_v16 = vadd.f32 %v471_v12, %v869_v36  ;;  %693 = vtanh.f32 %v328_v13  ;;  %v331_v33 = vpop.f32.mrb[14].mxu0  ;;  %v441_v50 = vadd.f32 %v440_v22, %v931_v2 }
 0x14f   :  { %v684_v18 = vpop.eup %683  ;;  %v488_v19 = vadd.f32 %v472_v34, %v863_v35  ;;  %v332_v20 = vadd.f32 %v331_v33, %v921_v51  ;;  %v333_v21 = vpop.f32.mrb[15].mxu0 }
 0x150   :  { %v686_v23 = vpop.eup %685  ;;  %503 = vst [vmem:[#allocation7 + $0x30] sm:$0xff] %v487_v16  ;;  %v473_v24 = vadd.f32 %v684_v18, %v427_v14  ;;  %v334_v25 = vadd.f32 %v333_v21, %v923_v52  ;;  %v444_v35 = vpop.f32.mrb[14].mxu1  ;;  %v439_v52 = vadd.f32 %v438_v17, %v929_v1 }
 0x151   :  { %504 = vst.msk [vmem:[#allocation7 + $0x38] sm:$0xff] %vm185_vm0, %v488_v19  ;;  %v474_v36 = vadd.f32 %v686_v23, %v429_v15  ;;  %695 = vtanh.f32 %v332_v20  ;;  %v446_v46 = vpop.f32.mrb[15].mxu1 }
 0x152   :  { %v489_v28 = vadd.f32 %v473_v24, %v879_v38  ;;  %697 = vtanh.f32 %v334_v25  ;;  %v447_v56 = vadd.f32 %v446_v46, %v931_v2 }
 0x153   :  { %v688_v51 = vpop.eup %687  ;;  %v490_v30 = vadd.f32 %v474_v36, %v873_v37  ;;  %v445_v37 = vadd.f32 %v444_v35, %v929_v1 }
 0x154   :  { %v690_v47 = vpop.eup %689  ;;  %505 = vst [vmem:[#allocation7 + $0x40] sm:$0xff] %v489_v28  ;;  %v475_v48 = vadd.f32 %v688_v51, %v433_v26 }
 0x155   :  { %506 = vst.msk [vmem:[#allocation7 + $0x48] sm:$0xff] %vm185_vm0, %v490_v30  ;;  %v476_v49 = vadd.f32 %v690_v47, %v435_v27 }
 0x156   :  { %v491_v29 = vadd.f32 %v475_v48, %v889_v41 }
 0x157   :  { %v692_v53 = vpop.eup %691  ;;  %v492_v38 = vadd.f32 %v476_v49, %v883_v39 }
 0x158   :  { %v694_v54 = vpop.eup %693  ;;  %507 = vst [vmem:[#allocation7 + $0x50] sm:$0xff] %v491_v29  ;;  %v477_v40 = vadd.f32 %v692_v53, %v439_v52 }
 0x159   :  { %508 = vst.msk [vmem:[#allocation7 + $0x58] sm:$0xff] %vm185_vm0, %v492_v38  ;;  %v478_v55 = vadd.f32 %v694_v54, %v441_v50 }
 0x15a   :  { %v493_v57 = vadd.f32 %v477_v40, %v899_v43 }
 0x15b   :  { %v696_v58 = vpop.eup %695  ;;  %v494_v59 = vadd.f32 %v478_v55, %v893_v42 }
 0x15c   :  { %v698_v60 = vpop.eup %697  ;;  %509 = vst [vmem:[#allocation7 + $0x60] sm:$0xff] %v493_v57  ;;  %v479_v41 = vadd.f32 %v696_v58, %v445_v37 }
 0x15d   :  { %510 = vst.msk [vmem:[#allocation7 + $0x68] sm:$0xff] %vm185_vm0, %v494_v59  ;;  %v480_v39 = vadd.f32 %v698_v60, %v447_v56 }
 0x15e   :  { %v495_v1 = vadd.f32 %v479_v41, %v909_v45 }
 0x15f   :  { %v496_v61 = vadd.f32 %v480_v39, %v903_v44 }
 0x160   :  { %511 = vst [vmem:[#allocation7 + $0x70] sm:$0xff] %v495_v1 }
 0x161   :  { %512 = vst.msk [vmem:[#allocation7 + $0x78] sm:$0xff] %vm185_vm0, %v496_v61 }
 0x162   :  { %754 = shalt.err (!%p751_p6)
}
 0x163   :  { %s755_s17 = scalar_lea.hbm %s1003_s3, 2048 }
 0x164   :  { %p756_p7 = scmp.ne.s32.totalorder %s1003_s3, %s755_s17  ;;  %p759_p8 = scmp.lt.u32.totalorder %s755_s17, %s1003_s3 }
 0x166   :  { %p761_p9 = pnand %p759_p8, %p756_p7 }
 0x168   :  { %764 = shalt.err (!%p761_p9)
}
 0x169   :  { %524 = dma.vmem_to_hbm [thread:$0]  %s519_s13, 2048, %s1003_s3, [#allocation4], %s772_s22, %s772_s22, %s773_s23  }
 0x16a   :  { %769 = dma.done.wait [#allocation4], 2048  }
 0x16b   :  { %770 = vsyncadd [#allocation4], 4294965248 }
 0x16c   :  { %528 = vsyncpa [#allocation3], 1 }
 0x16d   :  { %529 = vsyncpa [#allocation6], 1 }
 0x16e   :  { %530 = vsyncpa [#allocation4], 1 }

</bundles_post_ra>
